<compile_context>
chip_gen: v7x
topology: tpu7x:2x2x1
jax: 0.10.0
libtpu: 0.0.40
codegen_flags: <defaults>
</compile_context>

<pallas_src>
import math

import jax
import jax.numpy as jnp
from jax.experimental import pallas as pl
from jax.experimental.pallas import tpu as pltpu


# ----------------------------------------------------------------------------
# Pallas kernel: fused 3x3 conv (three block-Toeplitz matmuls) + bias + ReLU.
# Single invocation; all operands resident in VMEM.
# ----------------------------------------------------------------------------
def _conv3x3_bias_relu_kernel(xr_ref, wt_ref, b_ref, o_ref):
    # xr_ref: (N, H+2, (W+2)*C_in) bf16   spatially padded NHWC input, with the
    #                                     (W, C_in) pair fused on the lane axis
    # wt_ref: (3, (W+2)*C_in, W*C_out) bf16  block-Toeplitz weight slabs
    #                                        (one per kernel-row offset dh)
    # b_ref : (1, W*C_out) f32            bias tiled across W (lane = w*C_out+co)
    # o_ref : (N, H, W*C_out) f32         lane-dense output (last dim = 128 here)
    n = xr_ref.shape[0]
    _, h, wc_out = o_ref.shape            # h = H, wc_out = W * C_out
    kh = wt_ref.shape[0]                  # 3

    # Hoist weight slabs and bias once (reused across the batch loop).
    wts = [wt_ref[dh] for dh in range(kh)]          # each ((W+2)*C_in, W*C_out) bf16
    brow = b_ref[...]                               # (1, W*C_out) f32

    for nn in range(n):                             # unrolled; N is tiny
        acc = jnp.zeros((h, wc_out), jnp.float32)
        for dh in range(kh):                        # 3 MXU matmuls per image
            # rows dh..dh+H-1; (W, C_in) already fused on lanes, the dw
            # (column) shift is folded into the Toeplitz weights.
            lhs = xr_ref[nn, dh:dh + h, :]          # (H, (W+2)*C_in) bf16
            acc = acc + jnp.dot(lhs, wts[dh],
                                preferred_element_type=jnp.float32)
        # bias + ReLU on the f32 accumulator; full-lane (128-wide) store.
        o_ref[nn] = jnp.maximum(acc + brow, 0.0).astype(o_ref.dtype)


# ----------------------------------------------------------------------------
# Wrapper: layout glue (NCHW <-> fused-lane NHWC) + weight folding + the call.
# ----------------------------------------------------------------------------
@jax.jit
def conv3x3_bias_relu_pallas(x_nchw, w_oihw, bias):
    """3x3 same-padding conv + bias + ReLU (NCHW) via one Pallas TPU kernel."""
    N, C_in, H, W = x_nchw.shape
    C_out, _, KH, KW = w_oihw.shape       # KH = KW = 3

    # --- glue: NCHW -> padded NHWC, fuse (W, C_in) on lanes, pre-cast bf16 ----
    x_nhwc = jnp.transpose(x_nchw, (0, 2, 3, 1)).astype(jnp.float32)
    xp = jnp.pad(x_nhwc, ((0, 0), (1, 1), (1, 1), (0, 0)))
    xr = xp.reshape(N, H + 2, (W + 2) * C_in).astype(jnp.bfloat16)

    # --- block-Toeplitz weights: fold the dw (column) shift into the matmul ---
    # WT[dh, p*C_in + ci, w*C_out + co] = w[co, ci, dh, p - w] for p - w in {0,1,2}
    # (in a real model this is precomputed once from the conv weights).
    w_t = jnp.transpose(w_oihw, (2, 3, 1, 0)).astype(jnp.float32)   # (dh, dw, ci, co)
    shift = (jnp.arange(W + 2)[None, :, None]
             == jnp.arange(W)[None, None, :] + jnp.arange(KW)[:, None, None]
             ).astype(jnp.float32)                                  # (KW, W+2, W)
    WT = jnp.einsum("spq,hsio->hpiqo", shift, w_t)                  # (KH, W+2, C_in, W, C_out)
    WT = WT.reshape(KH, (W + 2) * C_in, W * C_out).astype(jnp.bfloat16)
    b_row = jnp.tile(bias.astype(jnp.float32), (W,)).reshape(1, W * C_out)

    # --- hot path: single Pallas invocation, everything resident in VMEM ------
    flops = 2 * N * KH * H * ((W + 2) * C_in) * (W * C_out)
    bytes_accessed = (xr.size * 2 + WT.size * 2 + b_row.size * 4
                      + N * H * W * C_out * 4)
    vmem = pl.BlockSpec(memory_space=pltpu.MemorySpace.VMEM)
    out3 = pl.pallas_call(
        _conv3x3_bias_relu_kernel,
        out_shape=jax.ShapeDtypeStruct((N, H, W * C_out), jnp.float32),
        in_specs=[vmem, vmem, vmem],
        out_specs=vmem,
        cost_estimate=pl.CostEstimate(flops=flops, transcendentals=0,
                                      bytes_accessed=bytes_accessed),
    )(xr, WT, b_row)

    # --- glue: lane-dense slab back to NCHW ------------------------------------
    out_nhwc = out3.reshape(N, H, W, C_out)
    return jnp.transpose(out_nhwc, (0, 3, 1, 2))                    # (N, C_out, H, W)


# ----------------------------------------------------------------------------
# Reference (plain JAX) for correctness check.
# ----------------------------------------------------------------------------
def conv3x3_bias_relu_ref(x_nchw, w_oihw, bias):
    y = jax.lax.conv_general_dilated(
        x_nchw, w_oihw,
        window_strides=(1, 1),
        padding=((1, 1), (1, 1)),
        dimension_numbers=("NCHW", "OIHW", "NCHW"),
    )
    y = y + bias.reshape(1, -1, 1, 1)
    return jnp.maximum(y, 0.0)


if __name__ == "__main__":
    N, C_in, H, W = 2, 4, 16, 16
    C_out = 8

    key = jax.random.PRNGKey(0)
    kx, kw, kb = jax.random.split(key, 3)

    # Deterministic parameter init mimicking PyTorch Conv2d default
    # (uniform in +/- 1/sqrt(fan_in)).
    fan_in = C_in * 3 * 3
    bound = 1.0 / math.sqrt(fan_in)
    w = jax.random.uniform(kw, (C_out, C_in, 3, 3), jnp.float32, -bound, bound)
    b = jax.random.uniform(kb, (C_out,), jnp.float32, -bound, bound)
    x = jax.random.normal(kx, (N, C_in, H, W), jnp.float32)

    out = jax.block_until_ready(conv3x3_bias_relu_pallas(x, w, b))
    ref = jax.block_until_ready(conv3x3_bias_relu_ref(x, w, b))

    assert out.shape == (N, C_out, H, W)
    # bf16 matmul operands (f32 accumulation) -> bf16-level tolerance vs f32 ref.
    assert jnp.allclose(out, ref, atol=5e-2, rtol=5e-2), "mismatch vs reference"

    print("KERNEL_OK")
</pallas_src>

<mosaic_0001>
module attributes {stable_mosaic.version = 11 : i64} {
  func.func @_conv3x3_bias_relu_kernel(%arg0: memref<2x18x72xbf16, #tpu.memory_space<vmem>>, %arg1: memref<3x72x128xbf16, #tpu.memory_space<vmem>>, %arg2: memref<1x128xf32, #tpu.memory_space<vmem>>, %arg3: memref<2x16x128xf32, #tpu.memory_space<vmem>>) attributes {dimension_semantics = [], scalar_prefetch = 0 : i64, scratch_operands = 0 : i64, tpu.core_type = #tpu.core_type<tc>} {
    %c0 = arith.constant 0 : index
    %c0_0 = arith.constant 0 : index
    %c0_1 = arith.constant 0 : index
    %0 = vector.load %arg1[%c0, %c0_0, %c0_1] : memref<3x72x128xbf16, #tpu.memory_space<vmem>>, vector<1x72x128xbf16>
    %1 = vector.shape_cast %0 : vector<1x72x128xbf16> to vector<72x128xbf16>
    %c1 = arith.constant 1 : index
    %c0_2 = arith.constant 0 : index
    %c0_3 = arith.constant 0 : index
    %2 = vector.load %arg1[%c1, %c0_2, %c0_3] : memref<3x72x128xbf16, #tpu.memory_space<vmem>>, vector<1x72x128xbf16>
    %3 = vector.shape_cast %2 : vector<1x72x128xbf16> to vector<72x128xbf16>
    %c2 = arith.constant 2 : index
    %c0_4 = arith.constant 0 : index
    %c0_5 = arith.constant 0 : index
    %4 = vector.load %arg1[%c2, %c0_4, %c0_5] : memref<3x72x128xbf16, #tpu.memory_space<vmem>>, vector<1x72x128xbf16>
    %5 = vector.shape_cast %4 : vector<1x72x128xbf16> to vector<72x128xbf16>
    %c0_6 = arith.constant 0 : index
    %c0_7 = arith.constant 0 : index
    %6 = vector.load %arg2[%c0_6, %c0_7] : memref<1x128xf32, #tpu.memory_space<vmem>>, vector<1x128xf32>
    %cst = arith.constant 0.000000e+00 : f32
    %7 = vector.broadcast %cst : f32 to vector<16x128xf32>
    %c0_8 = arith.constant 0 : index
    %c0_9 = arith.constant 0 : index
    %c0_10 = arith.constant 0 : index
    %8 = vector.load %arg0[%c0_8, %c0_9, %c0_10] : memref<2x18x72xbf16, #tpu.memory_space<vmem>>, vector<1x16x72xbf16>
    %9 = vector.shape_cast %8 : vector<1x16x72xbf16> to vector<16x72xbf16>
    %cst_11 = arith.constant dense<0.000000e+00> : vector<16x128xf32>
    %10 = tpu.matmul %9, %1, %cst_11 {dimension_numbers = #tpu.dot_dimension_numbers<[1], [0], [0], [1], [0, 0, 1, 1], [], []>} : vector<16x72xbf16>, vector<72x128xbf16>, vector<16x128xf32> -> vector<16x128xf32>
    %11 = arith.addf %7, %10 : vector<16x128xf32>
    %c0_12 = arith.constant 0 : index
    %c1_13 = arith.constant 1 : index
    %c0_14 = arith.constant 0 : index
    %12 = vector.load %arg0[%c0_12, %c1_13, %c0_14] : memref<2x18x72xbf16, #tpu.memory_space<vmem>>, vector<1x16x72xbf16>
    %13 = vector.shape_cast %12 : vector<1x16x72xbf16> to vector<16x72xbf16>
    %cst_15 = arith.constant dense<0.000000e+00> : vector<16x128xf32>
    %14 = tpu.matmul %13, %3, %cst_15 {dimension_numbers = #tpu.dot_dimension_numbers<[1], [0], [0], [1], [0, 0, 1, 1], [], []>} : vector<16x72xbf16>, vector<72x128xbf16>, vector<16x128xf32> -> vector<16x128xf32>
    %15 = arith.addf %11, %14 : vector<16x128xf32>
    %c0_16 = arith.constant 0 : index
    %c2_17 = arith.constant 2 : index
    %c0_18 = arith.constant 0 : index
    %16 = vector.load %arg0[%c0_16, %c2_17, %c0_18] : memref<2x18x72xbf16, #tpu.memory_space<vmem>>, vector<1x16x72xbf16>
    %17 = vector.shape_cast %16 : vector<1x16x72xbf16> to vector<16x72xbf16>
    %cst_19 = arith.constant dense<0.000000e+00> : vector<16x128xf32>
    %18 = tpu.matmul %17, %5, %cst_19 {dimension_numbers = #tpu.dot_dimension_numbers<[1], [0], [0], [1], [0, 0, 1, 1], [], []>} : vector<16x72xbf16>, vector<72x128xbf16>, vector<16x128xf32> -> vector<16x128xf32>
    %19 = arith.addf %15, %18 : vector<16x128xf32>
    %20 = vector.broadcast %6 : vector<1x128xf32> to vector<16x128xf32>
    %21 = arith.addf %19, %20 : vector<16x128xf32>
    %cst_20 = arith.constant 0.000000e+00 : f32
    %22 = vector.broadcast %cst_20 : f32 to vector<16x128xf32>
    %23 = arith.maximumf %21, %22 : vector<16x128xf32>
    %c0_21 = arith.constant 0 : index
    %c0_22 = arith.constant 0 : index
    %c0_23 = arith.constant 0 : index
    %24 = vector.load %arg3[%c0_21, %c0_22, %c0_23] : memref<2x16x128xf32, #tpu.memory_space<vmem>>, vector<1x16x128xf32>
    %25 = vector.shape_cast %24 : vector<1x16x128xf32> to vector<16x128xf32>
    %26 = vector.shape_cast %23 : vector<16x128xf32> to vector<1x16x128xf32>
    tpu.vector_store %arg3[%c0_21, %c0_22, %c0_23], %26 {strides = array<i32>} : memref<2x16x128xf32, #tpu.memory_space<vmem>>, vector<1x16x128xf32>,
    %cst_24 = arith.constant 0.000000e+00 : f32
    %27 = vector.broadcast %cst_24 : f32 to vector<16x128xf32>
    %c1_25 = arith.constant 1 : index
    %c0_26 = arith.constant 0 : index
    %c0_27 = arith.constant 0 : index
    %28 = vector.load %arg0[%c1_25, %c0_26, %c0_27] : memref<2x18x72xbf16, #tpu.memory_space<vmem>>, vector<1x16x72xbf16>
    %29 = vector.shape_cast %28 : vector<1x16x72xbf16> to vector<16x72xbf16>
    %cst_28 = arith.constant dense<0.000000e+00> : vector<16x128xf32>
    %30 = tpu.matmul %29, %1, %cst_28 {dimension_numbers = #tpu.dot_dimension_numbers<[1], [0], [0], [1], [0, 0, 1, 1], [], []>} : vector<16x72xbf16>, vector<72x128xbf16>, vector<16x128xf32> -> vector<16x128xf32>
    %31 = arith.addf %27, %30 : vector<16x128xf32>
    %c1_29 = arith.constant 1 : index
    %c1_30 = arith.constant 1 : index
    %c0_31 = arith.constant 0 : index
    %32 = vector.load %arg0[%c1_29, %c1_30, %c0_31] : memref<2x18x72xbf16, #tpu.memory_space<vmem>>, vector<1x16x72xbf16>
    %33 = vector.shape_cast %32 : vector<1x16x72xbf16> to vector<16x72xbf16>
    %cst_32 = arith.constant dense<0.000000e+00> : vector<16x128xf32>
    %34 = tpu.matmul %33, %3, %cst_32 {dimension_numbers = #tpu.dot_dimension_numbers<[1], [0], [0], [1], [0, 0, 1, 1], [], []>} : vector<16x72xbf16>, vector<72x128xbf16>, vector<16x128xf32> -> vector<16x128xf32>
    %35 = arith.addf %31, %34 : vector<16x128xf32>
    %c1_33 = arith.constant 1 : index
    %c2_34 = arith.constant 2 : index
    %c0_35 = arith.constant 0 : index
    %36 = vector.load %arg0[%c1_33, %c2_34, %c0_35] : memref<2x18x72xbf16, #tpu.memory_space<vmem>>, vector<1x16x72xbf16>
    %37 = vector.shape_cast %36 : vector<1x16x72xbf16> to vector<16x72xbf16>
    %cst_36 = arith.constant dense<0.000000e+00> : vector<16x128xf32>
    %38 = tpu.matmul %37, %5, %cst_36 {dimension_numbers = #tpu.dot_dimension_numbers<[1], [0], [0], [1], [0, 0, 1, 1], [], []>} : vector<16x72xbf16>, vector<72x128xbf16>, vector<16x128xf32> -> vector<16x128xf32>
    %39 = arith.addf %35, %38 : vector<16x128xf32>
    %40 = vector.broadcast %6 : vector<1x128xf32> to vector<16x128xf32>
    %41 = arith.addf %39, %40 : vector<16x128xf32>
    %cst_37 = arith.constant 0.000000e+00 : f32
    %42 = vector.broadcast %cst_37 : f32 to vector<16x128xf32>
    %43 = arith.maximumf %41, %42 : vector<16x128xf32>
    %c1_38 = arith.constant 1 : index
    %c0_39 = arith.constant 0 : index
    %c0_40 = arith.constant 0 : index
    %44 = vector.load %arg3[%c1_38, %c0_39, %c0_40] : memref<2x16x128xf32, #tpu.memory_space<vmem>>, vector<1x16x128xf32>
    %45 = vector.shape_cast %44 : vector<1x16x128xf32> to vector<16x128xf32>
    %46 = vector.shape_cast %43 : vector<16x128xf32> to vector<1x16x128xf32>
    tpu.vector_store %arg3[%c1_38, %c0_39, %c0_40], %46 {strides = array<i32>} : memref<2x16x128xf32, #tpu.memory_space<vmem>>, vector<1x16x128xf32>,
    return
  }
}

</mosaic_0001>

<bundles_post_ra>
// kernel: tile.8
= control target key start
LH: loop header
LB: loop body
LE: loop exit
PB: predicated region body
PF: predicated region fallthrough
CT: control target
= control target key end

     0   :  { %s28_s0 = inlined_call_operand.vmem [shape: f32[8], index: 0, kind: input, shape index: {}]   ;;  %s29_s1 = inlined_call_operand.vmem [shape: f32[16,8], index: 1, kind: output, shape index: {}]  }
   0x1   :  { %v4_v0 = vld [vmem:[%s28_s0] ss:$0 sm:$0xff] }
   0x2   :  { %5 = vst [vmem:[%s29_s1] sm:$0xff] %v4_v0  ;;  %8 = vst [vmem:[%s29_s1 + $0x8] sm:$0xff] %v4_v0 }

// kernel: tile.9
= control target key start
LH: loop header
LB: loop body
LE: loop exit
PB: predicated region body
PF: predicated region fallthrough
CT: control target
= control target key end

     0   :  { %s131_s10 = smov 120   ;;  %s132_s11 = smov 104   ;;  %vm3_vm0 = vcmask 64512   ;;  %vm9_vm1 = vcmask 1048512   ;;  %vm15_vm2 = vcmask 982912   ;;  %vm21_vm3 = vcmask 917312   ;;  %s207_s0 = inlined_call_operand.vmem [shape: f32[16,8], index: 0, kind: input, shape index: {}]   ;;  %s208_s1 = inlined_call_operand.vmem [shape: f32[1,128], index: 1, kind: output, shape index: {}]  }
   0x1   :  { %v101_v0 = vld [vmem:[%s207_s0 + $0xf] sm:$0x1]   ;;  %v103_v1 = vld [vmem:[%s207_s0 + $0xd] sm:$0x1]   ;;  %v102_v2 = vld [vmem:[%s207_s0 + $0xe] sm:$0x1]  }
   0x2   :  { %7 = vrot.lane.b32.xlu0 %v101_v0, %s131_s10  ;;  %19 = vrot.lane.b32.xlu1 %v103_v1, %s132_s11  ;;  %v104_v3 = vld [vmem:[%s207_s0 + $0xc] sm:$0x1]   ;;  %s133_s16 = smov 112   ;;  %s134_s17 = smov 96   ;;  %v105_v4 = vld [vmem:[%s207_s0 + $0xb] sm:$0x1]  }
   0x3   :  { %v106_v5 = vld [vmem:[%s207_s0 + $0xa] sm:$0x1]   ;;  %v2_v6 = vld [vmem:[%s207_s0] sm:$0x1]   ;;  %s135_s24 = smov 88   ;;  %s136_s25 = smov 80  }
   0x4   :  { %4 = vst.msk [vmem:[#allocation0] sm:$0x1] %vm3_vm0, %v2_v6   ;;  %v107_v7 = vld [vmem:[%s207_s0 + $0x9] sm:$0x1]   ;;  %v108_v8 = vld [vmem:[%s207_s0 + $0x8] sm:$0x1]  }
   0x5   :  { %s137_s30 = smov 72   ;;  %s138_s2 = smov 64   ;;  %v109_v9 = vld [vmem:[%s207_s0 + $0x7] sm:$0x1]   ;;  %v110_v10 = vld [vmem:[%s207_s0 + $0x6] sm:$0x1]  }
   0x6   :  { %13 = vrot.lane.b32.xlu0 %v102_v2, %s133_s16  ;;  %25 = vrot.lane.b32.xlu1 %v104_v3, %s134_s17  ;;  %s139_s7 = smov 56   ;;  %s140_s8 = smov 48   ;;  %v111_v11 = vld [vmem:[%s207_s0 + $0x5] sm:$0x1]   ;;  %v112_v12 = vld [vmem:[%s207_s0 + $0x4] sm:$0x1]  }
   0x7   :  { %s141_s13 = smov 40   ;;  %s142_s14 = smov 32   ;;  %v113_v13 = vld [vmem:[%s207_s0 + $0x3] sm:$0x1]   ;;  %v114_v14 = vld [vmem:[%s207_s0 + $0x2] sm:$0x1]  }
   0x8   :  { %s143_s19 = smov 24   ;;  %s144_s20 = smov 16   ;;  %v115_v15 = vld [vmem:[%s207_s0 + $0x1] sm:$0x1]   ;;  %vm27_vm4 = vcmask 851712   ;;  %vm33_vm5 = vcmask 786112  }
   0x9   :  { %s145_s0 = smov 8   ;;  %vm39_vm6 = vcmask 720512   ;;  %vm45_vm7 = vcmask 654912   ;;  %vm51_vm8 = vcmask 589312   ;;  %vm57_vm9 = vcmask 523712  }
   0xa   :  { %31 = vrot.lane.b32.xlu0 %v105_v4, %s135_s24  ;;  %37 = vrot.lane.b32.xlu1 %v106_v5, %s136_s25  ;;  %vm63_vm10 = vcmask 458112   ;;  %vm69_vm11 = vcmask 392512   ;;  %vm75_vm12 = vcmask 326912   ;;  %vm81_vm13 = vcmask 261312  }
   0xb   :  { %vm87_vm14 = vcmask 195712   ;;  %vm93_vm15 = vcmask 130112  }
   0xe   :  { %43 = vrot.lane.b32.xlu0 %v107_v7, %s137_s30  ;;  %49 = vrot.lane.b32.xlu1 %v108_v8, %s138_s2 }
  0x12   :  { %55 = vrot.lane.b32.xlu0 %v109_v9, %s139_s7  ;;  %61 = vrot.lane.b32.xlu1 %v110_v10, %s140_s8 }
  0x16   :  { %67 = vrot.lane.b32.xlu0 %v111_v11, %s141_s13  ;;  %73 = vrot.lane.b32.xlu1 %v112_v12, %s142_s14 }
  0x1a   :  { %79 = vrot.lane.b32.xlu0 %v113_v13, %s143_s19  ;;  %85 = vrot.lane.b32.xlu1 %v114_v14, %s144_s20 }
  0x1e   :  { %91 = vrot.lane.b32.xlu0 %v115_v15, %s145_s0 }
  0x74   :  { %v8_v16 = vpop.permute.xlu0 %7   ;;  %v20_v17 = vpop.permute.xlu1 %19  }
  0x75   :  { %10 = vst.msk [vmem:[#allocation0] sm:$0x1] %vm9_vm1, %v8_v16  }
  0x78   :  { %v14_v18 = vpop.permute.xlu0 %13   ;;  %v26_v19 = vpop.permute.xlu1 %25  }
  0x79   :  { %16 = vst.msk [vmem:[#allocation0] sm:$0x1] %vm15_vm2, %v14_v18  }
  0x7a   :  { %22 = vst.msk [vmem:[#allocation0] sm:$0x1] %vm21_vm3, %v20_v17  }
  0x7b   :  { %28 = vst.msk [vmem:[#allocation0] sm:$0x1] %vm27_vm4, %v26_v19  }
  0x7c   :  { %v32_v20 = vpop.permute.xlu0 %31   ;;  %v38_v21 = vpop.permute.xlu1 %37  }
  0x7d   :  { %34 = vst.msk [vmem:[#allocation0] sm:$0x1] %vm33_vm5, %v32_v20  }
  0x7e   :  { %40 = vst.msk [vmem:[#allocation0] sm:$0x1] %vm39_vm6, %v38_v21  }
  0x80   :  { %v44_v22 = vpop.permute.xlu0 %43   ;;  %v50_v23 = vpop.permute.xlu1 %49  }
  0x81   :  { %46 = vst.msk [vmem:[#allocation0] sm:$0x1] %vm45_vm7, %v44_v22  }
  0x82   :  { %52 = vst.msk [vmem:[#allocation0] sm:$0x1] %vm51_vm8, %v50_v23  }
  0x84   :  { %v56_v24 = vpop.permute.xlu0 %55   ;;  %v62_v25 = vpop.permute.xlu1 %61  }
  0x85   :  { %58 = vst.msk [vmem:[#allocation0] sm:$0x1] %vm57_vm9, %v56_v24  }
  0x86   :  { %64 = vst.msk [vmem:[#allocation0] sm:$0x1] %vm63_vm10, %v62_v25  }
  0x88   :  { %v68_v26 = vpop.permute.xlu0 %67   ;;  %v74_v27 = vpop.permute.xlu1 %73  }
  0x89   :  { %70 = vst.msk [vmem:[#allocation0] sm:$0x1] %vm69_vm11, %v68_v26  }
  0x8a   :  { %76 = vst.msk [vmem:[#allocation0] sm:$0x1] %vm75_vm12, %v74_v27  }
  0x8c   :  { %v80_v28 = vpop.permute.xlu0 %79   ;;  %v86_v29 = vpop.permute.xlu1 %85  }
  0x8d   :  { %82 = vst.msk [vmem:[#allocation0] sm:$0x1] %vm81_vm13, %v80_v28  }
  0x8e   :  { %88 = vst.msk [vmem:[#allocation0] sm:$0x1] %vm87_vm14, %v86_v29  }
  0x90   :  { %v92_v30 = vpop.permute.xlu0 %91  }
  0x91   :  { %94 = vst.msk [vmem:[#allocation0] sm:$0x1] %vm93_vm15, %v92_v30  }
  0x98   :  { %v98_v31 = vld [vmem:[#allocation0] sm:$0x1] }
  0x99   :  { %100 = vst [vmem:[%s208_s1] sm:$0x1] %v98_v31 }

// kernel: conv3x3_bias_relu_pallas.1
= control target key start
LH: loop header
LB: loop body
LE: loop exit
PB: predicated region body
PF: predicated region fallthrough
CT: control target
= control target key end

     0   :  { %v684_v0 = vmov 0.0   ;;  %vm685_vm0 = vmmov 0   ;;  %vm100_vm1 = vcmask 1043456   ;;  %vm56_vm2 = vsmask.f32 7424  ;;  %s882_s1 = inlined_call_operand.vmem [shape: bf16[3,72,128], index: 1, kind: input, shape index: {}]   ;;  %s883_s0 = inlined_call_operand.vmem [shape: bf16[2,18,72], index: 0, kind: input, shape index: {}]   ;;  %s884_s2 = inlined_call_operand.vmem [shape: f32[1,128], index: 2, kind: input, shape index: {}]   ;;  %s885_s3 = inlined_call_operand.vmem [shape: f32[2,16,128], index: 3, kind: output, shape index: {}]  }
   0x1   :  { %577 = vmatprep.subr.bf16.mxu0 %v684_v0  ;;  %591 = vmatprep.subr.bf16.mxu1 %v684_v0  ;;  %v663_v1 = vld [vmem:[%s882_s1 + $0x24] sm:$0xff]   ;;  %v665_v3 = vld [vmem:[%s882_s1 + $0x2c] sm:$0xff]   ;;  %v667_v5 = vld [vmem:[%s882_s1 + $0x34] sm:$0xff]   ;;  %vm96_vm3 = vcmask 588800   ;;  %vm222_vm4 = vcmask 1046528  }
   0x2   :  { %v714_v2 = vld [vmem:[%s882_s1] sm:$0xff]   ;;  %587 = vmatprep.mubr.msk.bf16.mxu0 %vm685_vm0, %v684_v0  ;;  %601 = vmatprep.mubr.msk.bf16.mxu1 %vm685_vm0, %v684_v0  ;;  %v728_v4 = vld [vmem:[%s882_s1 + $0x8] sm:$0xff]   ;;  %v739_v6 = vld [vmem:[%s882_s1 + $0x10] sm:$0xff]  }
   0x3   :  { %578 = vmatpush3.bf16.msra.mxu0 %v663_v1  ;;  %592 = vmatpush3.bf16.msra.mxu1 %v714_v2  ;;  %v745_v7 = vld [vmem:[%s882_s1 + $0x3c] sm:$0xff]   ;;  %v671_v8 = vld [vmem:[%s882_s1 + $0x44] ss:$0 sps:$4 sm:$0xff]   ;;  %v764_v13 = vld [vmem:[%s883_s0 + $0x8] ss:$0 sps:$4 sm:$0x11]  }
   0x4   :  { %579 = vmatprep.subr.bf16.mxu0 %v684_v0  ;;  %593 = vmatprep.subr.bf16.mxu1 %v684_v0  ;;  %v45_v9 = vld [vmem:[%s883_s0] sm:$0xf]  ;;  %v46_v10 = vld [vmem:[%s883_s0 + $0x4] sm:$0xf]  ;;  %v759_v11 = vld [vmem:[%s882_s1 + $0x18] sm:$0xff]   ;;  %v65_v17 = vshll.u32 %v764_v13, 16 }
   0x5   :  { %v507_v12 = vcombine.low %v45_v9, %v46_v10  ;;  %v672_v14 = vld [vmem:[%s882_s1 + $0x20] ss:$0 sps:$4 sm:$0xff]   ;;  %v102_v20 = vsel %vm100_vm1, %v671_v8, 0  ;;  %v675_v24 = vld [vmem:[%s882_s1 + $0x48] sm:$0xff]   ;;  %v794_v26 = vld [vmem:[%s883_s0 + $0x10] sm:$0xf] }
   0x6   :  { %v67_v19 = vrot.slane %v65_v17, 1  ;;  %v779_v21 = vsel %vm100_vm1, %v672_v14, 0  ;;  %v529_v25 = vld [vmem:[%s883_s0 + $0xc] sm:$0xf]  ;;  %v676_v27 = vld [vmem:[%s882_s1 + $0x50] sm:$0xff]   ;;  %v677_v29 = vld [vmem:[%s882_s1 + $0x58] sm:$0xff]  }
   0x7   :  { %580 = vmatpush3.bf16.msra.mxu0 %v665_v3  ;;  %594 = vmatpush3.bf16.msra.mxu1 %v728_v4  ;;  %v58_v15 = vshrl.u32 %v507_v12, 16  ;;  %v60_v16 = vshll.u32 %v507_v12, 16  ;;  %v803_v28 = vcombine.low %v529_v25, %v794_v26  ;;  %v218_v30 = vld [vmem:[%s883_s0] sm:$0xe]  ;;  %v679_v35 = vld [vmem:[%s882_s1 + $0x68] ss:$0 sps:$4 sm:$0xff]  }
   0x8   :  { %581 = vmatprep.subr.bf16.mxu0 %v684_v0  ;;  %595 = vmatprep.subr.bf16.mxu1 %v684_v0  ;;  %v682_v31 = vld [vmem:[%s883_s0 + $0x14] ss:$0 sps:$4 sm:$0x11]   ;;  %v678_v33 = vld [vmem:[%s882_s1 + $0x60] sm:$0xff]   ;;  %v521_v34 = vcombine.low %v218_v30, %v46_v10  ;;  %v224_v40 = vrot.slane %v764_v13, 1  ;;  %v257_v41 = vsel %vm100_vm1, %v679_v35, 0 }
   0x9   :  { %v62_v18 = vrot.slane %v60_v16, 1  ;;  %v329_v32 = vshll.u32 %v803_v28, 16  ;;  %v327_v36 = vshrl.u32 %v803_v28, 16  ;;  %v334_v38 = vshll.u32 %v682_v31, 16  ;;  %v536_v46 = vld [vmem:[%s883_s0 + $0xc] sm:$0xe] }
   0xa   :  { %v223_v39 = vrot.slane %v521_v34, 1  ;;  %v537_v47 = vcombine.low %v536_v46, %v794_v26  ;;  %v430_v49 = vrot.slane %v682_v31, 1  ;;  %v528_v61 = vld [vmem:[%s884_s2] ss:$0 sm:$0xff] }
   0xb   :  { %582 = vmatpush3.bf16.msra.mxu0 %v667_v5  ;;  %596 = vmatpush3.bf16.msra.mxu1 %v739_v6  ;;  %v63_v22 = vor.u32 %v62_v18, %v58_v15  ;;  %v331_v37 = vrot.slane %v329_v32, 1  ;;  %v336_v43 = vrot.slane %v334_v38, 1 }
   0xc   :  { %583 = vmatprep.subr.bf16.mxu0 %v684_v0  ;;  %597 = vmatprep.subr.bf16.mxu1 %v684_v0  ;;  %v225_v44 = vsel %vm222_vm4, %v223_v39, %v224_v40  ;;  %v429_v48 = vrot.slane %v537_v47, 1 }
   0xd   :  { %v68_v23 = vsel %vm56_vm2, %v63_v22, %v67_v19  ;;  %v332_v42 = vor.u32 %v331_v37, %v327_v36 }
   0xe   :  { %v431_v50 = vsel %vm222_vm4, %v429_v48, %v430_v49 }
   0xf   :  { %584 = vmatpush3.bf16.msra.mxu0 %v745_v7  ;;  %598 = vmatpush3.bf16.msra.mxu1 %v759_v11  ;;  %v337_v45 = vsel %vm56_vm2, %v332_v42, %v336_v43 }
  0x10   :  { %585 = vmatprep.subr.bf16.mxu0 %v684_v0  ;;  %599 = vmatprep.subr.bf16.mxu1 %v684_v0 }
  0x13   :  { %586 = vmatpush3.bf16.msra.mxu0 %v102_v20  ;;  %600 = vmatpush3.bf16.msra.mxu1 %v779_v21 }
  0x14   :  { %605 = vmatprep.subr.bf16.mxu0 %v684_v0  ;;  %619 = vmatprep.subr.bf16.mxu1 %v684_v0 }
  0x16   :  { %588 = vmatmul.mubr.msk.bf16.vlgmr.msra.gmra.mrb[0].mxu0 %vm96_vm3, %v68_v23  ;;  %602 = vmatmul.mubr.msk.bf16.vlgmr.msra.gmra.mrb[0].mxu1 %vm96_vm3, %v507_v12 }
  0x17   :  { %606 = vmatpush3.bf16.msra.mxu0 %v675_v24  ;;  %620 = vmatpush3.bf16.msra.mxu1 %v663_v1 }
  0x18   :  { %607 = vmatprep.subr.bf16.mxu0 %v684_v0  ;;  %621 = vmatprep.subr.bf16.mxu1 %v684_v0 }
  0x19   :  { %615 = vmatprep.mubr.msk.bf16.mxu0 %vm685_vm0, %v684_v0  ;;  %629 = vmatprep.mubr.msk.bf16.mxu1 %vm685_vm0, %v684_v0 }
  0x1b   :  { %608 = vmatpush3.bf16.msra.mxu0 %v676_v27  ;;  %622 = vmatpush3.bf16.msra.mxu1 %v665_v3 }
  0x1c   :  { %609 = vmatprep.subr.bf16.mxu0 %v684_v0  ;;  %623 = vmatprep.subr.bf16.mxu1 %v684_v0 }
  0x1f   :  { %610 = vmatpush3.bf16.msra.mxu0 %v677_v29  ;;  %624 = vmatpush3.bf16.msra.mxu1 %v667_v5 }
  0x20   :  { %611 = vmatprep.subr.bf16.mxu0 %v684_v0  ;;  %625 = vmatprep.subr.bf16.mxu1 %v684_v0 }
  0x23   :  { %612 = vmatpush3.bf16.msra.mxu0 %v678_v33  ;;  %626 = vmatpush3.bf16.msra.mxu1 %v745_v7 }
  0x24   :  { %613 = vmatprep.subr.bf16.mxu0 %v684_v0  ;;  %627 = vmatprep.subr.bf16.mxu1 %v684_v0 }
  0x27   :  { %614 = vmatpush3.bf16.msra.mxu0 %v257_v41  ;;  %628 = vmatpush3.bf16.msra.mxu1 %v102_v20 }
  0x28   :  { %633 = vmatprep.subr.bf16.mxu0 %v684_v0  ;;  %647 = vmatprep.subr.bf16.mxu1 %v684_v0 }
  0x2a   :  { %616 = vmatmul.mubr.msk.bf16.vlgmr.msra.gmra.mrb[4].mxu0 %vm96_vm3, %v225_v44  ;;  %630 = vmatmul.mubr.msk.bf16.vlgmr.msra.gmra.mrb[4].mxu1 %vm96_vm3, %v337_v45 }
  0x2b   :  { %634 = vmatpush3.bf16.msra.mxu0 %v714_v2  ;;  %648 = vmatpush3.bf16.msra.mxu1 %v675_v24 }
  0x2c   :  { %635 = vmatprep.subr.bf16.mxu0 %v684_v0  ;;  %649 = vmatprep.subr.bf16.mxu1 %v684_v0 }
  0x2d   :  { %643 = vmatprep.mubr.msk.bf16.mxu0 %vm685_vm0, %v684_v0  ;;  %657 = vmatprep.mubr.msk.bf16.mxu1 %vm685_vm0, %v684_v0 }
  0x2f   :  { %636 = vmatpush3.bf16.msra.mxu0 %v728_v4  ;;  %650 = vmatpush3.bf16.msra.mxu1 %v676_v27 }
  0x30   :  { %637 = vmatprep.subr.bf16.mxu0 %v684_v0  ;;  %651 = vmatprep.subr.bf16.mxu1 %v684_v0 }
  0x33   :  { %638 = vmatpush3.bf16.msra.mxu0 %v739_v6  ;;  %652 = vmatpush3.bf16.msra.mxu1 %v677_v29 }
  0x34   :  { %639 = vmatprep.subr.bf16.mxu0 %v684_v0  ;;  %653 = vmatprep.subr.bf16.mxu1 %v684_v0 }
  0x37   :  { %640 = vmatpush3.bf16.msra.mxu0 %v759_v11  ;;  %654 = vmatpush3.bf16.msra.mxu1 %v678_v33 }
  0x38   :  { %641 = vmatprep.subr.bf16.mxu0 %v684_v0  ;;  %655 = vmatprep.subr.bf16.mxu1 %v684_v0 }
  0x3b   :  { %642 = vmatpush3.bf16.msra.mxu0 %v779_v21  ;;  %656 = vmatpush3.bf16.msra.mxu1 %v257_v41 }
  0x3e   :  { %644 = vmatmul.mubr.msk.bf16.vlgmr.msra.gmra.mrb[8].mxu0 %vm96_vm3, %v803_v28  ;;  %658 = vmatmul.mubr.msk.bf16.vlgmr.msra.gmra.mrb[8].mxu1 %vm96_vm3, %v431_v50 }
  0xe9   :  { %v138_v51 = vpop.f32.mrb[0].mxu0  ;;  %v211_v52 = vpop.f32.mrb[0].mxu1 }
  0xea   :  { %v589_v53 = vpop.f32.mrb[1].mxu0  ;;  %v212_v54 = vadd.f32 %v211_v52, %v138_v51  ;;  %v603_v55 = vpop.f32.mrb[1].mxu1 }
  0xeb   :  { %v141_v56 = vpop.f32.mrb[2].mxu0  ;;  %v214_v57 = vpop.f32.mrb[2].mxu1 }
  0xec   :  { %v590_v58 = vpop.f32.mrb[3].mxu0  ;;  %v215_v59 = vadd.f32 %v214_v57, %v141_v56  ;;  %v604_v60 = vpop.f32.mrb[3].mxu1 }
  0xfd   :  { %v293_v62 = vpop.f32.mrb[4].mxu0  ;;  %v375_v0 = vpop.f32.mrb[4].mxu1 }
  0xfe   :  { %v300_v63 = vadd.f32 %v293_v62, %v212_v54  ;;  %v617_v1 = vpop.f32.mrb[5].mxu0  ;;  %v631_v2 = vpop.f32.mrb[5].mxu1 }
  0xff   :  { %v296_v3 = vpop.f32.mrb[6].mxu0  ;;  %v378_v6 = vpop.f32.mrb[6].mxu1 }
 0x100   :  { %v308_v4 = vadd.f32 %v528_v61, %v300_v63  ;;  %v301_v5 = vadd.f32 %v296_v3, %v215_v59  ;;  %v618_v7 = vpop.f32.mrb[7].mxu0  ;;  %v632_v8 = vpop.f32.mrb[7].mxu1 }
 0x102   :  { %v310_v9 = vmax.f32 %v308_v4, 0.0  ;;  %v309_v10 = vadd.f32 %v528_v61, %v301_v5 }
 0x104   :  { %312 = vst [vmem:[%s885_s3] sm:$0xff] %v310_v9  ;;  %v311_v11 = vmax.f32 %v309_v10, 0.0 }
 0x106   :  { %313 = vst [vmem:[%s885_s3 + $0x8] sm:$0xff] %v311_v11 }
 0x111   :  { %v418_v12 = vpop.f32.mrb[8].mxu0  ;;  %v469_v14 = vpop.f32.mrb[8].mxu1 }
 0x112   :  { %v419_v13 = vadd.f32 %v418_v12, %v375_v0  ;;  %v645_v15 = vpop.f32.mrb[9].mxu0  ;;  %v659_v16 = vpop.f32.mrb[9].mxu1 }
 0x113   :  { %v421_v17 = vpop.f32.mrb[10].mxu0  ;;  %v472_v20 = vpop.f32.mrb[10].mxu1 }
 0x114   :  { %v476_v18 = vadd.f32 %v469_v14, %v419_v13  ;;  %v422_v19 = vadd.f32 %v421_v17, %v378_v6  ;;  %v646_v21 = vpop.f32.mrb[11].mxu0  ;;  %v660_v22 = vpop.f32.mrb[11].mxu1 }
 0x116   :  { %v478_v23 = vadd.f32 %v528_v61, %v476_v18  ;;  %v477_v24 = vadd.f32 %v472_v20, %v422_v19 }
 0x118   :  { %v480_v25 = vmax.f32 %v478_v23, 0.0  ;;  %v479_v26 = vadd.f32 %v528_v61, %v477_v24 }
 0x11a   :  { %539 = vst [vmem:[%s885_s3 + $0x10] sm:$0xff] %v480_v25  ;;  %v481_v27 = vmax.f32 %v479_v26, 0.0 }
 0x11c   :  { %540 = vst [vmem:[%s885_s3 + $0x18] sm:$0xff] %v481_v27 }

</bundles_post_ra>
